<compile_context>
chip_gen: v7x
topology: tpu7x:2x2x1
jax: 0.10.0
libtpu: 0.0.40
codegen_flags: <defaults>
</compile_context>

<pallas_src>
import jax
import jax.numpy as jnp
from jax import lax
from jax.experimental import pallas as pl
from jax.experimental.pallas import tpu as pltpu


# ----------------------------------------------------------------------------
# Helpers: generation-aware tile budgets, sublane packing, block picking.
# ----------------------------------------------------------------------------
def _round_up(x, m):
    return ((x + m - 1) // m) * m


def _tpu_tile_params():
    """Pick VMEM limit and per-block byte targets based on the chip's VMEM."""
    try:
        info = pltpu.get_tpu_info()
        vmem_cap = int(getattr(info, "vmem_capacity_bytes", 64 << 20))
    except Exception:
        vmem_cap = 64 << 20  # conservative fallback (v7x-class)
    if vmem_cap >= (100 << 20):
        # v5e / v6e: 128 MiB VMEM -> big double-buffered tiles, high limit.
        return dict(vmem_limit=96 << 20, red_target=12 << 20,
                    app_target=6 << 20, small_vmem=False)
    # v7x: 64 MiB physical -> cap tiles (double-buffered in+out ~= 4x block).
    return dict(vmem_limit=48 << 20, red_target=8 << 20,
                app_target=5 << 20, small_vmem=True)


def _sublane_multiple(dtype):
    """Sub-32-bit dtypes pack along sublanes: require cb % (8*packing) == 0."""
    itemsize = jnp.dtype(dtype).itemsize
    packing = max(1, 4 // itemsize)
    return 8 * packing


def _pick_channel_block(c, bytes_per_channel, target_bytes, sublane_multiple):
    """Largest divisor of C whose block fits target_bytes, preferring divisors
    aligned to the (dtype-aware) sublane packing; falls back to any divisor."""
    limit = max(1, target_bytes // max(bytes_per_channel, 1))
    if limit >= c:
        return c
    best_aligned, best_any = 0, 1
    for d in range(1, min(limit, c) + 1):
        if c % d == 0:
            best_any = d
            if d % sublane_multiple == 0:
                best_aligned = d
    return best_aligned if best_aligned else best_any


# ----------------------------------------------------------------------------
# Kernel 1: per-(n,) sum of |x| over channels, lane-dense over T*V.
# Output (N, 1, TV) f32 is resident across the channel (reduction) grid axis.
# ----------------------------------------------------------------------------
def _abs_sum_kernel(x_ref, s_ref):
    # x_ref: (1, Cb, TV) tile     s_ref: (1, 1, TV) resident f32 accumulator
    @pl.when(pl.program_id(1) == 0)
    def _():
        s_ref[...] = jnp.zeros_like(s_ref)

    a = jnp.abs(x_ref[...]).astype(jnp.float32)          # (1, Cb, TV)
    s_ref[...] += jnp.sum(a, axis=1, keepdims=True)      # sublane reduce (VPU-heavy)


def _abs_sum(x_flat, cb, vmem_limit):
    n, c, tv = x_flat.shape
    return pl.pallas_call(
        _abs_sum_kernel,
        out_shape=jax.ShapeDtypeStruct((n, 1, tv), jnp.float32),
        grid=(n, c // cb),
        in_specs=[pl.BlockSpec((1, cb, tv), lambda ni, ci: (ni, ci, 0))],
        out_specs=pl.BlockSpec((1, 1, tv), lambda ni, ci: (ni, 0, 0)),
        compiler_params=pltpu.CompilerParams(
            dimension_semantics=("parallel", "arbitrary"),
            vmem_limit_bytes=vmem_limit,
        ),
    )(x_flat)


# ----------------------------------------------------------------------------
# Kernel 2: lane-dense apply — out = x * mask (mask already carries the global
# rescale, cast to x.dtype, broadcast over the channel chunk).
# ----------------------------------------------------------------------------
def _apply_kernel(x_ref, m_ref, o_ref):
    # x_ref: (1, Cb, TV)   m_ref: (1, 1, TV)   o_ref: (1, Cb, TV)
    o_ref[...] = (x_ref[...] * m_ref[...]).astype(o_ref.dtype)


def _apply(x_flat, mask_flat, cb, vmem_limit):
    n, c, tv = x_flat.shape
    return pl.pallas_call(
        _apply_kernel,
        out_shape=jax.ShapeDtypeStruct((n, c, tv), x_flat.dtype),
        grid=(n, c // cb),
        in_specs=[
            pl.BlockSpec((1, cb, tv), lambda ni, ci: (ni, ci, 0)),
            pl.BlockSpec((1, 1, tv), lambda ni, ci: (ni, 0, 0)),
        ],
        out_specs=pl.BlockSpec((1, cb, tv), lambda ni, ci: (ni, ci, 0)),
        compiler_params=pltpu.CompilerParams(
            dimension_semantics=("parallel", "parallel"),
            vmem_limit_bytes=vmem_limit,
        ),
    )(x_flat, mask_flat)


# ----------------------------------------------------------------------------
# Forward pass (jit-wrapped below; keep_prob/block_size/training are static).
# ----------------------------------------------------------------------------
def _dropblock_impl(x, key, keep_prob, block_size, training):
    if (not training) or keep_prob == 1:
        return x

    n, c, t, v = x.shape
    tv = t * v
    params = _tpu_tile_params()
    mult = _sublane_multiple(x.dtype)

    # Per-channel row bytes of a lane-dense (1, cb, TV) tile (lane padding incl.).
    lane_bytes = _round_up(tv, 128) * jnp.dtype(x.dtype).itemsize
    cb_red = _pick_channel_block(c, lane_bytes, params["red_target"], mult)
    cb_app = _pick_channel_block(c, 2 * lane_bytes, params["app_target"], mult)
    # v7x with N == 1: make sure the apply kernel has >= 2 parallel blocks so
    # both TensorCores get work (only if an aligned split exists).
    if params["small_vmem"] and n == 1 and cb_app == c:
        for d in range(c // 2, 0, -1):
            if c % d == 0 and d % mult == 0:
                cb_app = d
                break

    x_flat = x.reshape(n, c, tv)

    # ---- pass 1: sum of |x| over channels, then over V in glue -------------
    s = _abs_sum(x_flat, cb_red, params["vmem_limit"])        # (N, 1, TV) f32
    s_nt = jnp.sum(s.reshape(n, t, v), axis=2)                # (N, T)

    # ---- tiny (N, T) glue ---------------------------------------------------
    # mean over (c, v) then /sum * numel: the 1/(C*V) factor cancels, so
    # norm = sum|x| / total * (N*T).
    total = jnp.sum(s_nt)
    norm = s_nt * (n * t) / jnp.maximum(total, jnp.float32(1e-12))
    gamma = (1.0 - keep_prob) / block_size
    p = jnp.clip(norm * gamma, 0.0, 1.0)

    u = jax.random.uniform(key, (n, t), dtype=jnp.float32)
    m = (u < p).astype(jnp.float32)                           # seed mask

    # max_pool1d(kernel=block_size, stride=1, padding=block_size//2) over t as
    # block_size shifted maxima (m >= 0, so zero padding == -inf padding).
    pad = block_size // 2
    mp = jnp.pad(m, ((0, 0), (pad, block_size - 1 - pad)))
    msum = jnp.zeros_like(m)
    for k in range(block_size):
        msum = jnp.maximum(msum, lax.slice(mp, (0, k), (n, k + t)))

    keep = 1.0 - msum                                         # (N, T)
    denom = jnp.sum(keep)
    # mask.numel()/mask.sum() with mask (n, c*v, t) reduces to
    # (N*T)/sum_{n,t}(keep) since the mask is constant over (c, v).
    # Guard the all-dropped edge case (reference would produce inf/NaN).
    scale = jnp.where(denom > 0, (n * t) / denom, jnp.float32(0.0))
    keep_scaled = keep * scale                                # (N, T)

    # Repeat over V (index t*V+j <- keep[t]) so the apply kernel is a single
    # lane-dense multiply; cast to x.dtype so the multiply is native dtype.
    mask_flat = jnp.repeat(keep_scaled, v, axis=1).reshape(n, 1, tv).astype(x.dtype)

    # ---- pass 2: lane-dense elementwise multiply ----------------------------
    out = _apply(x_flat, mask_flat, cb_app, params["vmem_limit"])
    return out.reshape(n, c, t, v)


def randomized_dropblock_t_1d(x, key, keep_prob, *, block_size=7, training=True):
    return _dropblock_jit(x, key, keep_prob, block_size, training)


_dropblock_jit = jax.jit(
    _dropblock_impl, static_argnames=("keep_prob", "block_size", "training"))


if __name__ == "__main__":
    key = jax.random.PRNGKey(0)
    data_key, drop_key = jax.random.split(key)

    n, c, t, v = 2, 4, 16, 16
    x = jax.random.normal(data_key, (n, c, t, v), dtype=jnp.float32)

    out = randomized_dropblock_t_1d(x, drop_key, keep_prob=0.7,
                                    block_size=7, training=True)
    out = jax.block_until_ready(out)

    assert out.shape == (n, c, t, v)
    assert out.dtype == jnp.float32
    assert bool(jnp.all(jnp.isfinite(out)))

    # eval / keep_prob == 1 passthrough
    out_eval = randomized_dropblock_t_1d(x, drop_key, keep_prob=1.0)
    out_eval = jax.block_until_ready(out_eval)
    assert bool(jnp.all(out_eval == x))

    print("KERNEL_OK")
</pallas_src>

<mosaic_0001>
module attributes {stable_mosaic.version = 11 : i64} {
  func.func @_abs_sum_kernel(%arg0: i32, %arg1: i32, %arg2: memref<1x4x256xf32, #tpu.memory_space<vmem>>, %arg3: memref<1x1x256xf32, #tpu.memory_space<vmem>>) attributes {dimension_semantics = [#tpu.dimension_semantics<parallel>, #tpu.dimension_semantics<arbitrary>], iteration_bounds = array<i64: 2, 1>, scalar_prefetch = 0 : i64, scratch_operands = 0 : i64, tpu.core_type = #tpu.core_type<tc>, window_params = [{transform_indices = @transform_0, window_bounds = array<i64: 1, 4, 256>}, {transform_indices = @transform_1, window_bounds = array<i64: 1, 1, 256>}]} {
    %c0_i32 = arith.constant 0 : i32
    %0 = arith.cmpi eq, %arg1, %c0_i32 : i32
    %1 = arith.extui %0 : i1 to i32
    %c0_i32_0 = arith.constant 0 : i32
    %2 = arith.cmpi ne, %1, %c0_i32_0 : i32
    scf.if %2 {
      %cst_9 = arith.constant 0.000000e+00 : f32
      %10 = vector.broadcast %cst_9 : f32 to vector<1x1x256xf32>
      %c0_10 = arith.constant 0 : index
      %c0_11 = arith.constant 0 : index
      %c0_12 = arith.constant 0 : index
      %11 = vector.load %arg3[%c0_10, %c0_11, %c0_12] : memref<1x1x256xf32, #tpu.memory_space<vmem>>, vector<1x1x256xf32>
      tpu.vector_store %arg3[%c0_10, %c0_11, %c0_12], %10 {strides = array<i32>} : memref<1x1x256xf32, #tpu.memory_space<vmem>>, vector<1x1x256xf32>,
    } else {
    }
    %c0 = arith.constant 0 : index
    %c0_1 = arith.constant 0 : index
    %c0_2 = arith.constant 0 : index
    %3 = vector.load %arg2[%c0, %c0_1, %c0_2] : memref<1x4x256xf32, #tpu.memory_space<vmem>>, vector<1x4x256xf32>
    %4 = math.absf %3 : vector<1x4x256xf32>
    %c0_3 = arith.constant 0 : index
    %c0_4 = arith.constant 0 : index
    %c0_5 = arith.constant 0 : index
    %5 = vector.load %arg3[%c0_3, %c0_4, %c0_5] : memref<1x1x256xf32, #tpu.memory_space<vmem>>, vector<1x1x256xf32>
    %cst = arith.constant dense<0.000000e+00> : vector<1x256xf32>
    %6 = vector.multi_reduction <add>, %4, %cst [1] : vector<1x4x256xf32> to vector<1x256xf32>
    %7 = vector.shape_cast %6 : vector<1x256xf32> to vector<1x1x256xf32>
    %8 = arith.addf %5, %7 : vector<1x1x256xf32>
    %c0_6 = arith.constant 0 : index
    %c0_7 = arith.constant 0 : index
    %c0_8 = arith.constant 0 : index
    %9 = vector.load %arg3[%c0_6, %c0_7, %c0_8] : memref<1x1x256xf32, #tpu.memory_space<vmem>>, vector<1x1x256xf32>
    tpu.vector_store %arg3[%c0_6, %c0_7, %c0_8], %8 {strides = array<i32>} : memref<1x1x256xf32, #tpu.memory_space<vmem>>, vector<1x1x256xf32>,
    return
  }
  func.func @transform_0(%arg0: i32, %arg1: i32) -> (i32, i32, i32) {
    %c0_i32 = arith.constant 0 : i32
    %c0_i32_0 = arith.constant 0 : i32
    return %arg0, %arg1, %c0_i32 : i32, i32, i32
  }
  func.func @transform_1(%arg0: i32, %arg1: i32) -> (i32, i32, i32) {
    %c0_i32 = arith.constant 0 : i32
    %c0_i32_0 = arith.constant 0 : i32
    %c0_i32_1 = arith.constant 0 : i32
    return %arg0, %c0_i32, %c0_i32_0 : i32, i32, i32
  }
}

module attributes {stable_mosaic.version = 11 : i64} {
  func.func @_apply_kernel(%arg0: i32, %arg1: i32, %arg2: memref<1x4x256xf32, #tpu.memory_space<vmem>>, %arg3: memref<1x1x256xf32, #tpu.memory_space<vmem>>, %arg4: memref<1x4x256xf32, #tpu.memory_space<vmem>>) attributes {dimension_semantics = [#tpu.dimension_semantics<parallel>, #tpu.dimension_semantics<parallel>], iteration_bounds = array<i64: 2, 1>, scalar_prefetch = 0 : i64, scratch_operands = 0 : i64, tpu.core_type = #tpu.core_type<tc>, window_params = [{transform_indices = @transform_0, window_bounds = array<i64: 1, 4, 256>}, {transform_indices = @transform_1, window_bounds = array<i64: 1, 1, 256>}, {transform_indices = @transform_2, window_bounds = array<i64: 1, 4, 256>}]} {
    %c0 = arith.constant 0 : index
    %c0_0 = arith.constant 0 : index
    %c0_1 = arith.constant 0 : index
    %0 = vector.load %arg2[%c0, %c0_0, %c0_1] : memref<1x4x256xf32, #tpu.memory_space<vmem>>, vector<1x4x256xf32>
    %c0_2 = arith.constant 0 : index
    %c0_3 = arith.constant 0 : index
    %c0_4 = arith.constant 0 : index
    %1 = vector.load %arg3[%c0_2, %c0_3, %c0_4] : memref<1x1x256xf32, #tpu.memory_space<vmem>>, vector<1x1x256xf32>
    %2 = vector.broadcast %1 : vector<1x1x256xf32> to vector<1x4x256xf32>
    %3 = arith.mulf %0, %2 : vector<1x4x256xf32>
    %c0_5 = arith.constant 0 : index
    %c0_6 = arith.constant 0 : index
    %c0_7 = arith.constant 0 : index
    %4 = vector.load %arg4[%c0_5, %c0_6, %c0_7] : memref<1x4x256xf32, #tpu.memory_space<vmem>>, vector<1x4x256xf32>
    tpu.vector_store %arg4[%c0_5, %c0_6, %c0_7], %3 {strides = array<i32>} : memref<1x4x256xf32, #tpu.memory_space<vmem>>, vector<1x4x256xf32>,
    return
  }
  func.func @transform_0(%arg0: i32, %arg1: i32) -> (i32, i32, i32) {
    %c0_i32 = arith.constant 0 : i32
    %c0_i32_0 = arith.constant 0 : i32
    return %arg0, %arg1, %c0_i32 : i32, i32, i32
  }
  func.func @transform_1(%arg0: i32, %arg1: i32) -> (i32, i32, i32) {
    %c0_i32 = arith.constant 0 : i32
    %c0_i32_0 = arith.constant 0 : i32
    %c0_i32_1 = arith.constant 0 : i32
    return %arg0, %c0_i32, %c0_i32_0 : i32, i32, i32
  }
  func.func @transform_2(%arg0: i32, %arg1: i32) -> (i32, i32, i32) {
    %c0_i32 = arith.constant 0 : i32
    %c0_i32_0 = arith.constant 0 : i32
    return %arg0, %arg1, %c0_i32 : i32, i32, i32
  }
}

</mosaic_0001>

<bundles_post_ra>
// kernel: _dropblock_impl.2
= control target key start
LH: loop header
LB: loop body
LE: loop exit
PB: predicated region body
PF: predicated region fallthrough
CT: control target
= control target key end

     0   :  { %s338_s6 = smov 0   ;;  %s340_s7 = smov 0   ;;  %s384_s0 = inlined_call_operand.vmem [shape: f32[2,4,256], index: 0, kind: input, shape index: {}]   ;;  %s385_s1 = inlined_call_operand.vmem [shape: f32[2,1,256], index: 1, kind: output, shape index: {}]  }
   0x1   :  { %s342_s8 = smov 0  }
   0x2 LB: > { %s23_s9 = sadd.s32 1, %s320_s7  ;;  %p269_p0 = scmp.ge.s32.totalorder %s324_s8, 1  ;;  %s324_s8 = sphi %s342_s8, %s11_s8   ;;  %s320_s7 = sphi %s340_s7, %s389_s7   ;;  %s316_s6 = sphi %s338_s6, %s388_s6  }
   0x3   : > { %p25_p1 = scmp.ge.s32.totalorder %s23_s9, 2  ;;  %p105_p2 = scmp.lt.s32.totalorder %s324_s8, 3 }
   0x5   : > { %s391_s9 = smov (%p25_p1, %s23_s9), 0  ;;  %p106_p3 = pnand %p269_p0, %p105_p2 }
   0x6   : > { %p128_p4 = scmp.lt.s32.totalorder (!%p106_p3), %s316_s6, 1  ;;  %v145_v0 = vlaneseq (!%p106_p3)  ;;  %v326_v2 = vmov (!%p106_p3), 0.0   ;;  %vm156_vm1 = vcmask (!%p106_p3), 1043456   ;;  %v327_v13 = vmov (!%p106_p3), 1966171168  }
   0x7   : > { %109 = sbr.rel (%p106_p3) target bundleno = 44 (0x2c), region = 24  ;;  %v175_v14 = vunpack.c.l.s4 (!%p106_p3), %v327_v13 }
   0x8   : > { %vm356_vm0 = vcmp.lt.s32.totalorder (!%p106_p3), %v145_v0, 256  ;;  %v178_v20 = vshrl.u32 (!%p106_p3), %v145_v0, 7 }
   0x9   : > { %v176_v19 = vunpack.c.0.s8 (!%p106_p3), %v175_v14 }
   0xb   : > { %v179_v24 = vsub.s32 (!%p106_p3), %v176_v19, %v178_v20 }
   0xe   : > { %s393_s6 = smov (!%p128_p4, %s316_s6), 1 }
   0xf   : > { %s275_s10 = sshll.u32 %s393_s6, 3  ;;  %s272_s11 = sshll.u32 %s393_s6, 1 }
  0x10   : > { %s136_s14 = scalar_lea.vmem %s384_s0, %s275_s10  ;;  %s366_s17 = scalar_lea.vmem %s385_s1, %s272_s11 }
  0x11   : > { %149 = vst.msk [vmem:[%s366_s17] sm:$0x3] %vm356_vm0, %v326_v2  ;;  %v150_v3 = vld [vmem:[%s136_s14] sm:$0xff] }
  0x12   : > { %v151_v4 = vand.u32 2147483647, %v150_v3 }
  0x14   : > { %v154_v5 = vcombine.high %v151_v4, %v151_v4  ;;  %v157_v6 = vsel %vm156_vm1, %v151_v4, 0.0 }
  0x15   : > { %v158_v7 = vrot.slane %v157_v6, 4 }
  0x16   : > { %v164_v8 = vsel %vm156_vm1, %v154_v5, 0.0 }
  0x17   : > { %v159_v9 = vadd.f32 %v158_v7, %v157_v6  ;;  %v165_v10 = vrot.slane %v164_v8, 4 }
  0x18   : > { %v152_v27 = vld [vmem:[%s366_s17] sm:$0x3] }
  0x19   : > { %v160_v11 = vrot.slane %v159_v9, 2  ;;  %v166_v12 = vadd.f32 %v165_v10, %v164_v8 }
  0x1b   : > { %v161_v15 = vadd.f32 %v160_v11, %v159_v9  ;;  %v167_v16 = vrot.slane %v166_v12, 2 }
  0x1d   : > { %v162_v17 = vrot.slane %v161_v15, 1  ;;  %v168_v18 = vadd.f32 %v167_v16, %v166_v12 }
  0x1f   : > { %v163_v21 = vadd.f32 %v162_v17, %v161_v15  ;;  %v169_v22 = vrot.slane %v168_v18, 1 }
  0x21   : > { %v170_v23 = vadd.f32 %v169_v22, %v168_v18 }
  0x23   : > { %v173_v25 = vcombine.low %v163_v21, %v170_v23 }
  0x25   : > { %v180_v26 = vrot.slane %v173_v25, %v179_v24 }
  0x27   : > { %v187_v28 = vrot.slane %v180_v26, %v179_v24 }
  0x29   : > { %v189_v29 = vadd.f32 %v187_v28, %v152_v27 }
  0x2b   : > { %194 = vst.msk [vmem:[%s366_s17] sm:$0x3] %vm356_vm0, %v189_v29 }
  0x2c PF: > { %s11_s8 = sadd.s32 1, %s324_s8   ;;  %s388_s6 = smov %s320_s7 }
  0x2d   : > { %p8_p5 = scmp.ge.s32.totalorder %s11_s8, 4   ;;  %s389_s7 = smov %s391_s9 }
  0x2f   :  { %10 = sbr.rel (!%p8_p5) target bundleno = 2 (0x2), region = 58 }

// kernel: _dropblock_impl.3
= control target key start
LH: loop header
LB: loop body
LE: loop exit
PB: predicated region body
PF: predicated region fallthrough
CT: control target
= control target key end

     0   :  { %s393_s9 = smov 0   ;;  %s395_s10 = smov 0   ;;  %s426_s0 = inlined_call_operand.vmem [shape: f32[2,4,256], index: 0, kind: input, shape index: {}]   ;;  %s427_s1 = inlined_call_operand.vmem [shape: f32[2,1,256], index: 1, kind: input, shape index: {}]   ;;  %s428_s2 = inlined_call_operand.vmem [shape: f32[2,4,256], index: 2, kind: output, shape index: {}]  }
   0x1   :  { %s397_s11 = smov 0  }
   0x2 LB: > { %s24_s12 = sadd.s32 1, %s372_s10  ;;  %p320_p0 = scmp.ge.s32.totalorder %s376_s11, 1  ;;  %s376_s11 = sphi %s397_s11, %s12_s11   ;;  %s372_s10 = sphi %s395_s10, %s430_s10   ;;  %s368_s9 = sphi %s393_s9, %s429_s9  }
   0x3   : > { %p26_p1 = scmp.ge.s32.totalorder %s24_s12, 2  ;;  %p141_p2 = scmp.lt.s32.totalorder %s376_s11, 3 }
   0x5   : > { %s432_s12 = smov (%p26_p1, %s24_s12), 0  ;;  %p142_p3 = pnand %p320_p0, %p141_p2 }
   0x6   : > { %p175_p4 = scmp.lt.s32.totalorder (!%p142_p3), %s368_s9, 1  ;;  %v200_v0 = vlaneseq (!%p142_p3) }
   0x7   : > { %145 = sbr.rel (%p142_p3) target bundleno = 25 (0x19), region = 28 }
   0x8   : > { %v201_v1 = vshrl.u32 (!%p142_p3), %v200_v0, 7 }
   0xa   : > { %v202_v2 = vsub.s32 (!%p142_p3), 0, %v201_v1  ;;  %v206_v3 = vsub.s32 (!%p142_p3), 1, %v201_v1 }
   0xe   : > { %s434_s9 = smov (!%p175_p4, %s368_s9), 1 }
   0xf   : > { %s328_s13 = sshll.u32 %s434_s9, 3  ;;  %s323_s14 = sshll.u32 %s434_s9, 1 }
  0x10   : > { %s183_s17 = scalar_lea.vmem %s426_s0, %s328_s13  ;;  %s187_s20 = scalar_lea.vmem %s427_s1, %s323_s14 }
  0x11   : > { %v198_v4 = vld [vmem:[%s187_s20] sm:$0x3]  ;;  %s196_s23 = scalar_lea.vmem %s428_s2, %s328_s13 }
  0x12   : > { %v203_v5 = vrot.slane %v198_v4, %v202_v2  ;;  %v207_v6 = vrot.slane %v198_v4, %v206_v3  ;;  %v197_v7 = vld [vmem:[%s183_s17] sm:$0xff] }
  0x14   : > { %v208_v8 = vcombine.low %v203_v5, %v207_v6 }
  0x16   : > { %v210_v9 = vmul.f32 %v208_v8, %v197_v7 }
  0x18   : > { %211 = vst [vmem:[%s196_s23] sm:$0xff] %v210_v9 }
  0x19 PF: > { %s12_s11 = sadd.s32 1, %s376_s11   ;;  %s429_s9 = smov %s372_s10 }
  0x1a   : > { %p9_p5 = scmp.ge.s32.totalorder %s12_s11, 4   ;;  %s430_s10 = smov %s432_s12 }
  0x1c   :  { %11 = sbr.rel (!%p9_p5) target bundleno = 2 (0x2), region = 61 }

</bundles_post_ra>
